<compile_context>
chip_gen: v6e
topology: v6e:2x2x1
jax: 0.10.0
libtpu: 0.0.40
codegen_flags: <defaults>
</compile_context>

<pallas_src>
import functools
import math

import jax
import jax.numpy as jnp
from jax.experimental import pallas as pl
from jax.experimental.pallas import tpu as pltpu


def _round_up(x, m):
    return ((x + m - 1) // m) * m


def _head_kernel(x_ref, p_ref, o_ref, *, k, hd, o, r_w1, r_b1, r_w2, r_b2):
    # x_ref: [B, K]   p_ref: [R, CW] packed params   o_ref: [B, O]
    x = x_ref[...]                                            # [B, K]

    # fc1 (1x1 "pool" conv pre-folded into its weight/bias) + ReLU.
    w1 = p_ref[r_w1:r_w1 + k, :]                              # [K, CW]
    b1 = p_ref[r_b1:r_b1 + 1, :]                              # [1, CW]
    h = jnp.maximum(
        jnp.dot(x, w1, preferred_element_type=jnp.float32) + b1, 0.0)
    h = h[:, :hd]                                             # no-op when CW == Hd

    # fc2 (padded columns of w2/b2 are zero -> slice the result).
    w2 = p_ref[r_w2:r_w2 + hd, :]                             # [Hd, CW]
    b2 = p_ref[r_b2:r_b2 + 1, :]                              # [1, CW]
    y = jnp.dot(h, w2, preferred_element_type=jnp.float32) + b2
    o_ref[...] = y[:, :o]


def _pack_params(params, C, H, W):
    """Fold pool conv into fc1, pre-transpose, pack everything into one slab."""
    pw, pb = params["pool_w"], params["pool_b"]               # [OC, C], [OC]
    w1, b1 = params["fc1_w"], params["fc1_b"]                 # [Hd, OC*HW], [Hd]
    w2, b2 = params["fc2_w"], params["fc2_b"]                 # [O, Hd], [O]
    OC = pw.shape[0]
    HW = H * W
    Hd, F = w1.shape
    O = w2.shape[0]
    K = C * HW
    assert F == OC * HW, (F, OC, HW)

    # Fold:  fea @ w1.T  ==  x_flat @ W1f_T   with
    #   W1f_T[c*HW + s, d] = sum_o w1[d, o*HW + s] * pw[o, c]
    #   b1f[d]             = b1[d] + sum_{o,s} w1[d, o*HW + s] * pb[o]
    w1_r = w1.reshape(Hd, OC, HW)
    w1f_t = jnp.einsum("dos,oc->csd", w1_r, pw).reshape(K, Hd).astype(jnp.float32)
    b1f = (b1 + jnp.einsum("dos,o->d", w1_r, pb)).astype(jnp.float32)
    w2_t = w2.T.astype(jnp.float32)                           # [Hd, O]

    CW = max(Hd, O)
    r_w1 = 0
    r_b1 = _round_up(K, 8)
    r_w2 = r_b1 + 8
    r_b2 = r_w2 + _round_up(Hd, 8)
    n_rows = r_b2 + 8

    slab = jnp.zeros((n_rows, CW), jnp.float32)
    slab = slab.at[r_w1:r_w1 + K, :Hd].set(w1f_t)
    slab = slab.at[r_b1, :Hd].set(b1f)
    slab = slab.at[r_w2:r_w2 + Hd, :O].set(w2_t)
    slab = slab.at[r_b2, :O].set(b2.astype(jnp.float32))
    meta = dict(k=K, hd=Hd, o=O, r_w1=r_w1, r_b1=r_b1, r_w2=r_w2, r_b2=r_b2)
    return slab, meta


def regression_head(x, params):
    """x: [B, C, H, W] backbone feature map (NCHW). Returns reg: [B, anchors*2+1]."""
    B, C, H, W = x.shape
    slab, meta = _pack_params(params, C, H, W)
    K, Hd, O = meta["k"], meta["hd"], meta["o"]

    # Free metadata reshape; NCHW flatten order (c*HW + h*W + w) matches the fold.
    x_flat = x.reshape(B, K).astype(jnp.float32)

    kernel = functools.partial(_head_kernel, **meta)

    flops = 2 * B * (K * Hd + Hd * O)
    bytes_accessed = 4 * (x_flat.size + slab.size + B * O)

    return pl.pallas_call(
        kernel,
        out_shape=jax.ShapeDtypeStruct((B, O), jnp.float32),
        grid=(1,),
        in_specs=[
            pl.BlockSpec((B, K), lambda i: (0, 0)),
            pl.BlockSpec(slab.shape, lambda i: (0, 0)),
        ],
        out_specs=pl.BlockSpec((B, O), lambda i: (0, 0)),
        compiler_params=pltpu.CompilerParams(
            dimension_semantics=("arbitrary",),
        ),
        cost_estimate=pl.CostEstimate(
            flops=flops, transcendentals=0, bytes_accessed=bytes_accessed),
    )(x_flat, slab)


def _reference(x, params):
    """Pure-JAX reference mirroring the PyTorch forward exactly."""
    pooled = (
        jnp.einsum("oc,bchw->bohw", params["pool_w"], x)
        + params["pool_b"][None, :, None, None]
    )
    fea = pooled.reshape(x.shape[0], -1)
    h = jnp.maximum(fea @ params["fc1_w"].T + params["fc1_b"], 0.0)
    return h @ params["fc2_w"].T + params["fc2_b"]


if __name__ == "__main__":
    # Small config consistent with the module:
    #   backbone.out_channels[-1] = 16, reduction_factor = 8, input_shape = (3, 32, 32)
    #   -> backbone feature map [B, 16, ceil(32/8), ceil(32/8)] = [2, 16, 4, 4]
    #   pool_channels = 8, fc_hidden_size = 32, anchors = 4 -> out_dim = 9
    B, C_in = 2, 16
    input_hw = (32, 32)
    reduction_factor = 8
    Hs = math.ceil(input_hw[0] / reduction_factor)
    Ws = math.ceil(input_hw[1] / reduction_factor)
    pool_channels = 8
    fc_hidden = 32
    anchors = 4
    out_dim = anchors * 2 + 1
    F = pool_channels * Hs * Ws

    key = jax.random.PRNGKey(0)
    ks = jax.random.split(key, 7)

    x = jax.random.normal(ks[0], (B, C_in, Hs, Ws), dtype=jnp.float32)
    params = dict(
        pool_w=0.10 * jax.random.normal(ks[1], (pool_channels, C_in), jnp.float32),
        pool_b=0.10 * jax.random.normal(ks[2], (pool_channels,), jnp.float32),
        fc1_w=0.05 * jax.random.normal(ks[3], (fc_hidden, F), jnp.float32),
        fc1_b=0.05 * jax.random.normal(ks[4], (fc_hidden,), jnp.float32),
        fc2_w=0.05 * jax.random.normal(ks[5], (out_dim, fc_hidden), jnp.float32),
        fc2_b=0.05 * jax.random.normal(ks[6], (out_dim,), jnp.float32),
    )

    reg = regression_head(x, params)
    reg = jax.block_until_ready(reg)

    assert reg.shape == (B, out_dim), reg.shape
    ref = _reference(x, params)
    assert jnp.allclose(reg, ref, atol=1e-4, rtol=1e-4), (
        float(jnp.max(jnp.abs(reg - ref)))
    )
    print("KERNEL_OK")
</pallas_src>

<mosaic_0001>
module attributes {stable_mosaic.version = 11 : i64} {
  func.func @_head_kernel(%arg0: i32, %arg1: memref<2x256xf32, #tpu.memory_space<vmem>>, %arg2: memref<304x32xf32, #tpu.memory_space<vmem>>, %arg3: memref<2x9xf32, #tpu.memory_space<vmem>>) attributes {dimension_semantics = [#tpu.dimension_semantics<arbitrary>], iteration_bounds = array<i64: 1>, scalar_prefetch = 0 : i64, scratch_operands = 0 : i64, tpu.core_type = #tpu.core_type<tc>, window_params = [{pipeline_mode = #tpu.pipeline_mode<synchronous>, transform_indices = @transform_0, window_bounds = array<i64: 2, 256>}, {pipeline_mode = #tpu.pipeline_mode<synchronous>, transform_indices = @transform_1, window_bounds = array<i64: 304, 32>}, {pipeline_mode = #tpu.pipeline_mode<synchronous>, transform_indices = @transform_2, window_bounds = array<i64: 2, 9>}]} {
    %c0 = arith.constant 0 : index
    %c0_0 = arith.constant 0 : index
    %0 = vector.load %arg1[%c0, %c0_0] : memref<2x256xf32, #tpu.memory_space<vmem>>, vector<2x256xf32>
    %c0_1 = arith.constant 0 : index
    %c0_2 = arith.constant 0 : index
    %1 = vector.load %arg2[%c0_1, %c0_2] : memref<304x32xf32, #tpu.memory_space<vmem>>, vector<256x32xf32>
    %c256 = arith.constant 256 : index
    %c0_3 = arith.constant 0 : index
    %2 = vector.load %arg2[%c256, %c0_3] : memref<304x32xf32, #tpu.memory_space<vmem>>, vector<1x32xf32>
    %cst = arith.constant dense<0.000000e+00> : vector<2x32xf32>
    %3 = tpu.matmul %0, %1, %cst {dimension_numbers = #tpu.dot_dimension_numbers<[1], [0], [0], [1], [0, 0, 1, 1], [], []>} : vector<2x256xf32>, vector<256x32xf32>, vector<2x32xf32> -> vector<2x32xf32>
    %4 = vector.broadcast %2 : vector<1x32xf32> to vector<2x32xf32>
    %5 = arith.addf %3, %4 : vector<2x32xf32>
    %cst_4 = arith.constant 0.000000e+00 : f32
    %6 = vector.broadcast %cst_4 : f32 to vector<2x32xf32>
    %7 = arith.maximumf %5, %6 : vector<2x32xf32>
    %c264 = arith.constant 264 : index
    %c0_5 = arith.constant 0 : index
    %8 = vector.load %arg2[%c264, %c0_5] : memref<304x32xf32, #tpu.memory_space<vmem>>, vector<32x32xf32>
    %c296 = arith.constant 296 : index
    %c0_6 = arith.constant 0 : index
    %9 = vector.load %arg2[%c296, %c0_6] : memref<304x32xf32, #tpu.memory_space<vmem>>, vector<1x32xf32>
    %cst_7 = arith.constant dense<0.000000e+00> : vector<2x32xf32>
    %10 = tpu.matmul %7, %8, %cst_7 {dimension_numbers = #tpu.dot_dimension_numbers<[1], [0], [0], [1], [0, 0, 1, 1], [], []>} : vector<2x32xf32>, vector<32x32xf32>, vector<2x32xf32> -> vector<2x32xf32>
    %11 = vector.broadcast %9 : vector<1x32xf32> to vector<2x32xf32>
    %12 = arith.addf %10, %11 : vector<2x32xf32>
    %13 = vector.extract_strided_slice %12 {offsets = [0, 0], sizes = [2, 9], strides = [1, 1]} : vector<2x32xf32> to vector<2x9xf32>
    %c0_8 = arith.constant 0 : index
    %c0_9 = arith.constant 0 : index
    %14 = vector.load %arg3[%c0_8, %c0_9] : memref<2x9xf32, #tpu.memory_space<vmem>>, vector<2x9xf32>
    tpu.vector_store %arg3[%c0_8, %c0_9], %13 {strides = array<i32>} : memref<2x9xf32, #tpu.memory_space<vmem>>, vector<2x9xf32>,
    return
  }
  func.func @transform_0(%arg0: i32) -> (i32, i32) {
    %c0_i32 = arith.constant 0 : i32
    %c0_i32_0 = arith.constant 0 : i32
    %c0_i32_1 = arith.constant 0 : i32
    return %c0_i32, %c0_i32_0 : i32, i32
  }
  func.func @transform_1(%arg0: i32) -> (i32, i32) {
    %c0_i32 = arith.constant 0 : i32
    %c0_i32_0 = arith.constant 0 : i32
    %c0_i32_1 = arith.constant 0 : i32
    return %c0_i32, %c0_i32_0 : i32, i32
  }
  func.func @transform_2(%arg0: i32) -> (i32, i32) {
    %c0_i32 = arith.constant 0 : i32
    %c0_i32_0 = arith.constant 0 : i32
    %c0_i32_1 = arith.constant 0 : i32
    return %c0_i32, %c0_i32_0 : i32, i32
  }
}

</mosaic_0001>

<bundles_post_ra>
// kernel: tpu_custom_call.1
= control target key start
LH: loop header
LB: loop body
LE: loop exit
PB: predicated region body
PF: predicated region fallthrough
CT: control target
= control target key end

     0   :  { %s449_s0 = inlined_call_operand.vmem [shape: f32[2,256], index: 0, kind: input, shape index: {}]   ;;  %s450_s1 = inlined_call_operand.vmem [shape: f32[304,32], index: 1, kind: input, shape index: {}]   ;;  %s451_s2 = inlined_call_operand.hbm [shape: f32[2,9], index: 2, kind: output, shape index: {}]  }
   0x1   :  { %v44_v0 = vld [vmem:[%s450_s1 + $0xf8] sm:$0xff]  ;;  %v43_v2 = vld [vmem:[%s450_s1 + $0xf0] sm:$0xff]  ;;  %v42_v4 = vld [vmem:[%s450_s1 + $0xe8] sm:$0xff] }
   0x2   :  { %v28_v1 = vld [vmem:[%s450_s1 + $0x78] sm:$0xff]  ;;  %235 = vmatprep.subr.mxu0 %v44_v0  ;;  %v27_v3 = vld [vmem:[%s450_s1 + $0x70] sm:$0xff]  ;;  %v26_v5 = vld [vmem:[%s450_s1 + $0x68] sm:$0xff] }
   0x3   :  { %236 = vmatpush3.msra.mxu0 %v28_v1  ;;  %v41_v6 = vld [vmem:[%s450_s1 + $0xe0] sm:$0xff]  ;;  %v40_v8 = vld [vmem:[%s450_s1 + $0xd8] sm:$0xff]  ;;  %v39_v10 = vld [vmem:[%s450_s1 + $0xd0] sm:$0xff] }
   0x4   :  { %237 = vmatprep.subr.mxu0 %v43_v2  ;;  %v25_v7 = vld [vmem:[%s450_s1 + $0x60] sm:$0xff]  ;;  %v24_v9 = vld [vmem:[%s450_s1 + $0x58] sm:$0xff]  ;;  %v23_v11 = vld [vmem:[%s450_s1 + $0x50] sm:$0xff] }
   0x5   :  { %238 = vmatpush3.msra.mxu0 %v27_v3  ;;  %v38_v12 = vld [vmem:[%s450_s1 + $0xc8] sm:$0xff]  ;;  %v232_v13 = vld.sshfl [vmem:[%s449_s0] sm:$0x33 pattern:$0x76325410] }
   0x6   :  { %239 = vmatprep.subr.mxu0 %v42_v4  ;;  %v22_v14 = vld [vmem:[%s450_s1 + $0x48] sm:$0xff]  ;;  %v58_v15 = vcombine.high %v232_v13, %v232_v13 }
   0x7   :  { %240 = vmatpush3.msra.mxu0 %v26_v5 }
   0x8   :  { %241 = vmatprep.subr.mxu0 %v41_v6 }
   0x9   :  { %242 = vmatpush3.msra.mxu0 %v25_v7 }
   0xa   :  { %243 = vmatprep.subr.mxu0 %v40_v8 }
   0xb   :  { %244 = vmatpush3.msra.mxu0 %v24_v9 }
   0xc   :  { %245 = vmatprep.subr.mxu0 %v39_v10 }
   0xd   :  { %7 = vsyncpa [#allocation3], 0  ;;  %246 = vmatpush3.msra.mxu0 %v23_v11  ;;  %v37_v16 = vld [vmem:[%s450_s1 + $0xc0] sm:$0xff]  ;;  %125 = vmatprep.mubr.f32.mxu0 %v58_v15  ;;  %v36_v18 = vld [vmem:[%s450_s1 + $0xb8] sm:$0xff]  ;;  %v311_v34 = vmov 0.0   ;;  %vm312_vm0 = vmmov 0  }
   0xe   :  { %247 = vmatprep.subr.mxu0 %v38_v12  ;;  %v21_v17 = vld [vmem:[%s450_s1 + $0x40] sm:$0xff]  ;;  %v20_v19 = vld [vmem:[%s450_s1 + $0x38] sm:$0xff]  ;;  %v35_v20 = vld [vmem:[%s450_s1 + $0xb0] sm:$0xff]  ;;  %275 = vmatprep.subr.mxu1 %v311_v34  ;;  %vm141_vm1 = vcmask 261120   ;;  %s313_s29 = smov [#allocation2]   ;;  %vm215_vm2 = vcmask 66560  }
   0xf   :  { %248 = vmatpush3.msra.mxu0 %v22_v14  ;;  %v19_v21 = vld [vmem:[%s450_s1 + $0x30] sm:$0xff]  ;;  %v34_v22 = vld [vmem:[%s450_s1 + $0xa8] sm:$0xff]  ;;  %v33_v24 = vld [vmem:[%s450_s1 + $0xa0] sm:$0xff]  ;;  %283 = vmatprep.mubr.msk.f32.mxu1 %vm312_vm0, %v311_v34  ;;  %s223_s30 = sshll.u32 %s313_s29, 4  ;;  %s224_s30 = int_to_ptr.vmem [resolvable:$true] %s223_s30 }
  0x10   :  { %249 = vmatprep.subr.mxu0 %v37_v16  ;;  %v18_v23 = vld [vmem:[%s450_s1 + $0x28] sm:$0xff]  ;;  %v17_v25 = vld [vmem:[%s450_s1 + $0x20] sm:$0xff]  ;;  %v32_v26 = vld [vmem:[%s450_s1 + $0x98] sm:$0xff]  ;;  %s289_s3 = scalar_lea.vmem %s224_s30, 32  ;;  %p294_p1 = scmp.lt.s32.totalorder %s224_s30, %s224_s30 }
  0x11   :  { %250 = vmatpush3.msra.mxu0 %v21_v17  ;;  %v16_v27 = vld [vmem:[%s450_s1 + $0x18] sm:$0xff]  ;;  %v31_v28 = vld [vmem:[%s450_s1 + $0x90] sm:$0xff]  ;;  %v30_v30 = vld [vmem:[%s450_s1 + $0x88] sm:$0xff]  ;;  %p290_p0 = scmp.ne.s32.totalorder %s224_s30, %s289_s3  ;;  %p295_p2 = scmp.lt.s32.totalorder %s289_s3, %s289_s3 }
  0x12   :  { %251 = vmatprep.subr.mxu0 %v36_v18  ;;  %v15_v29 = vld [vmem:[%s450_s1 + $0x10] sm:$0xff]  ;;  %v14_v31 = vld [vmem:[%s450_s1 + $0x8] sm:$0xff]  ;;  %v29_v32 = vld [vmem:[%s450_s1 + $0x80] sm:$0xff] }
  0x13   :  { %252 = vmatpush3.msra.mxu0 %v20_v19  ;;  %v13_v33 = vld [vmem:[%s450_s1] sm:$0xff]  ;;  %v134_v36 = vld [vmem:[%s450_s1 + $0x118] sm:$0xff]  ;;  %v133_v37 = vld [vmem:[%s450_s1 + $0x110] sm:$0xff]  ;;  %p296_p3 = por %p295_p2, %p294_p1 }
  0x14   :  { %253 = vmatprep.subr.mxu0 %v35_v20  ;;  %v135_v35 = vld [vmem:[%s450_s1 + $0x120] sm:$0xff]  ;;  %v132_v38 = vld [vmem:[%s450_s1 + $0x108] sm:$0xff] }
  0x15   :  { %254 = vmatpush3.msra.mxu0 %v19_v21  ;;  %276 = vmatpush3.msra.mxu1 %v135_v35  ;;  %v231_v40 = vld [vmem:[%s450_s1 + $0x100] ss:$0 sm:$0xff]  ;;  %v233_v45 = vld [vmem:[%s450_s1 + $0x128] ss:$0 sm:$0xff]  ;;  %p297_p4 = pnand %p296_p3, %p290_p0 }
  0x16   :  { %255 = vmatprep.subr.mxu0 %v34_v22  ;;  %277 = vmatprep.subr.mxu1 %v311_v34 }
  0x17   :  { %256 = vmatpush3.msra.mxu0 %v18_v23  ;;  %278 = vmatpush3.msra.mxu1 %v134_v36 }
  0x18   :  { %257 = vmatprep.subr.mxu0 %v33_v24  ;;  %279 = vmatprep.subr.mxu1 %v311_v34 }
  0x19   :  { %258 = vmatpush3.msra.mxu0 %v17_v25  ;;  %280 = vmatpush3.msra.mxu1 %v133_v37 }
  0x1a   :  { %259 = vmatprep.subr.mxu0 %v32_v26  ;;  %281 = vmatprep.subr.mxu1 %v311_v34 }
  0x1b   :  { %260 = vmatpush3.msra.mxu0 %v16_v27  ;;  %282 = vmatpush3.msra.mxu1 %v132_v38 }
  0x1c   :  { %261 = vmatprep.subr.mxu0 %v31_v28 }
  0x1d   :  { %262 = vmatpush3.msra.mxu0 %v15_v29 }
  0x1e   :  { %263 = vmatprep.subr.mxu0 %v30_v30 }
  0x1f   :  { %264 = vmatpush3.msra.mxu0 %v14_v31 }
  0x20   :  { %265 = vmatprep.subr.mxu0 %v29_v32 }
  0x21   :  { %266 = vmatpush3.msra.mxu0 %v13_v33 }
  0x22   :  { %126 = vmatmul.mubr.f32.vlgmr.msra.gmra.mxu0 %v232_v13 }
  0xe2   :  { %v267_v39 = vpop.f32.mrf.mxu0 }
  0xe4   :  { %v268_v41 = vpop.f32.mrf.mxu0 }
  0xe5   :  { %v269_v42 = vadd.f32 %v268_v41, %v267_v39 }
  0xe7   :  { %v128_v43 = vadd.f32 %v269_v42, %v231_v40 }
  0xe9   :  { %v131_v44 = vmax.f32 %v128_v43, 0.0 }
  0xeb   :  { %284 = vmatmul.mubr.msk.f32.vlgmr.msra.gmra.mxu1 %vm141_vm1, %v131_v44 }
 0x1ab   :  { %v211_v46 = vpop.f32.mrf.mxu1 }
 0x1ac   :  { %v212_v47 = vadd.f32 %v233_v45, %v211_v46 }
 0x1ad   :  { %v285_v48 = vpop.f32.mrf.mxu1 }
 0x1ae   :  { %216 = vst.msk [vmem:[#allocation2] sm:$0x3] %vm215_vm2, %v212_v47 }
 0x1af   :  { %300 = shalt.err (!%p297_p4)
}
 0x1b0   :  { %226 = dma.vmem_to_hbm [thread:$0]  %s224_s30, 32, %s451_s2, [#allocation3]  }
 0x1b1   :  { %309 = dma.done.wait [#allocation3], 32  }
 0x1b2   :  { %310 = vsyncadd [#allocation3], 4294967264 }
 0x1b3   :  { %230 = vsyncpa [#allocation3], 1 }

</bundles_post_ra>
